<compile_context>
chip_gen: v5e
topology: v5e:2x2
jax: 0.10.0
libtpu: 0.0.40
codegen_flags: <defaults>
</compile_context>

<pallas_src>
import functools

import jax
import jax.numpy as jnp
from jax.experimental import pallas as pl
from jax.experimental.pallas import tpu as pltpu

IN_F, HID_F, OUT_F = 30, 50, 30


def mlp_kernel(x_ref, w1_ref, b1_ref, w2_ref, b2_ref, o_ref):
    # Fused fc1 -> ReLU -> fc2 on one (tb, IN_F) batch tile.  Weights/biases
    # are VMEM-resident across all grid steps (constant index_maps).
    x = x_ref[...]
    h = jnp.dot(x, w1_ref[...], preferred_element_type=jnp.float32) + b1_ref[...]
    h = jnp.maximum(h, 0.0)
    out = jnp.dot(h, w2_ref[...], preferred_element_type=jnp.float32) + b2_ref[...]
    o_ref[...] = out.astype(o_ref.dtype)


def _round_up(n, m):
    return ((n + m - 1) // m) * m


def _xla_forward(x, w1, b1, w2, b2):
    return jnp.maximum(x @ w1 + b1, 0.0) @ w2 + b2


@functools.partial(jax.jit, static_argnames=("block_b", "min_pallas_batch"))
def convnet_forward(x, w1, b1, w2, b2, *, block_b=8192, min_pallas_batch=4096):
    """x: (B, 30) f32 -> (B, 30) f32, matching ConvNet.forward."""
    B = x.shape[0]
    in_f, hid_f = w1.shape          # (30, 50)
    out_f = w2.shape[1]             # 30

    # Small-batch fallback: plain XLA beats any kernel below the HBM-roofline
    # regime (pad/slice + launch overhead dominate).
    if B < min_pallas_batch:
        return _xla_forward(x, w1, b1, w2, b2)

    # --- batch tiling: tb multiple of 8, capped at block_b -------------------
    tb = min(block_b, _round_up(B, 8))
    # Guarantee >= 2 grid steps so the "parallel" batch axis can shard across
    # v7x's two TensorCores (no effect on single-TC v5e/v6e).
    if tb > 8 and _round_up(B, tb) // tb < 2:
        tb = _round_up(tb // 2, 8)
    b_pad = _round_up(B, tb)

    # Explicit zero batch pad keeps the discarded tail rows deterministic.
    xp = x if b_pad == B else jnp.pad(x, ((0, b_pad - B), (0, 0)))

    grid = (b_pad // tb,)
    # Activation blocks span the full (narrow) feature dim -> contiguous DMA.
    x_spec = pl.BlockSpec((tb, in_f), lambda i: (i, 0))
    o_spec = pl.BlockSpec((tb, out_f), lambda i: (i, 0))
    # Constant block index => weights/biases DMA'd once, stay VMEM-resident.
    w1_spec = pl.BlockSpec((in_f, hid_f), lambda i: (0, 0))
    w2_spec = pl.BlockSpec((hid_f, out_f), lambda i: (0, 0))
    b1_spec = pl.BlockSpec((1, hid_f), lambda i: (0, 0))
    b2_spec = pl.BlockSpec((1, out_f), lambda i: (0, 0))

    flops = 2 * b_pad * (in_f * hid_f + hid_f * out_f)
    param_bytes = (in_f * hid_f + hid_f + hid_f * out_f + out_f) * 4
    bytes_accessed = b_pad * (in_f + out_f) * 4 + param_bytes

    out_padded = pl.pallas_call(
        mlp_kernel,
        out_shape=jax.ShapeDtypeStruct((b_pad, out_f), jnp.float32),
        grid=grid,
        in_specs=[x_spec, w1_spec, b1_spec, w2_spec, b2_spec],
        out_specs=o_spec,
        compiler_params=pltpu.CompilerParams(
            dimension_semantics=("parallel",),       # shard batch across TCs (v7x)
            vmem_limit_bytes=48 * 1024 * 1024,       # safe on v7x's 64 MiB VMEM
        ),
        cost_estimate=pl.CostEstimate(
            flops=flops, transcendentals=0, bytes_accessed=bytes_accessed
        ),
    )(xp, w1, b1, w2, b2)

    return out_padded[:B] if b_pad != B else out_padded


def init_params(key):
    # Deterministic init mimicking nn.Linear default: U(-1/sqrt(fan_in), ...).
    k1, k2, k3, k4 = jax.random.split(key, 4)
    lim1 = 1.0 / jnp.sqrt(float(IN_F))
    lim2 = 1.0 / jnp.sqrt(float(HID_F))
    w1 = jax.random.uniform(k1, (IN_F, HID_F), jnp.float32, -lim1, lim1)
    b1 = jax.random.uniform(k2, (1, HID_F), jnp.float32, -lim1, lim1)
    w2 = jax.random.uniform(k3, (HID_F, OUT_F), jnp.float32, -lim2, lim2)
    b2 = jax.random.uniform(k4, (1, OUT_F), jnp.float32, -lim2, lim2)
    return w1, b1, w2, b2


if __name__ == "__main__":
    key = jax.random.PRNGKey(0)
    kx, kx2, kp = jax.random.split(key, 3)
    w1, b1, w2, b2 = init_params(kp)

    def ref_forward(x):
        return jnp.maximum(x @ w1 + b1, 0.0) @ w2 + b2

    # Small batch (typical module usage); force the Pallas path for the test.
    B = 8
    x = jax.random.normal(kx, (B, IN_F), jnp.float32)
    out = convnet_forward(x, w1, b1, w2, b2, min_pallas_batch=0)
    jax.block_until_ready(out)
    assert out.shape == (B, OUT_F)
    assert jnp.allclose(out, ref_forward(x), atol=1e-5, rtol=1e-5)

    # Non-multiple-of-tile batch: exercises batch padding + a multi-step grid
    # (tb is halved so grid=(2,), which also checks the v7x megacore path).
    B2 = 300
    x2 = jax.random.normal(kx2, (B2, IN_F), jnp.float32)
    out2 = convnet_forward(x2, w1, b1, w2, b2, min_pallas_batch=0)
    jax.block_until_ready(out2)
    assert out2.shape == (B2, OUT_F)
    assert jnp.allclose(out2, ref_forward(x2), atol=1e-5, rtol=1e-5)

    print("KERNEL_OK")
</pallas_src>

<mosaic_0001>
module attributes {stable_mosaic.version = 11 : i64} {
  func.func @mlp_kernel(%arg0: i32, %arg1: memref<8x30xf32, #tpu.memory_space<vmem>>, %arg2: memref<30x50xf32, #tpu.memory_space<vmem>>, %arg3: memref<1x50xf32, #tpu.memory_space<vmem>>, %arg4: memref<50x30xf32, #tpu.memory_space<vmem>>, %arg5: memref<1x30xf32, #tpu.memory_space<vmem>>, %arg6: memref<8x30xf32, #tpu.memory_space<vmem>>) attributes {dimension_semantics = [#tpu.dimension_semantics<parallel>], iteration_bounds = array<i64: 1>, scalar_prefetch = 0 : i64, scratch_operands = 0 : i64, tpu.core_type = #tpu.core_type<tc>, window_params = [{transform_indices = @transform_0, window_bounds = array<i64: 8, 30>}, {pipeline_mode = #tpu.pipeline_mode<synchronous>, transform_indices = @transform_1, window_bounds = array<i64: 30, 50>}, {pipeline_mode = #tpu.pipeline_mode<synchronous>, transform_indices = @transform_2, window_bounds = array<i64: 1, 50>}, {pipeline_mode = #tpu.pipeline_mode<synchronous>, transform_indices = @transform_3, window_bounds = array<i64: 50, 30>}, {pipeline_mode = #tpu.pipeline_mode<synchronous>, transform_indices = @transform_4, window_bounds = array<i64: 1, 30>}, {transform_indices = @transform_5, window_bounds = array<i64: 8, 30>}]} {
    %c0 = arith.constant 0 : index
    %c0_0 = arith.constant 0 : index
    %0 = vector.load %arg1[%c0, %c0_0] : memref<8x30xf32, #tpu.memory_space<vmem>>, vector<8x30xf32>
    %c0_1 = arith.constant 0 : index
    %c0_2 = arith.constant 0 : index
    %1 = vector.load %arg2[%c0_1, %c0_2] : memref<30x50xf32, #tpu.memory_space<vmem>>, vector<30x50xf32>
    %cst = arith.constant dense<0.000000e+00> : vector<8x50xf32>
    %2 = tpu.matmul %0, %1, %cst {dimension_numbers = #tpu.dot_dimension_numbers<[1], [0], [0], [1], [0, 0, 1, 1], [], []>} : vector<8x30xf32>, vector<30x50xf32>, vector<8x50xf32> -> vector<8x50xf32>
    %c0_3 = arith.constant 0 : index
    %c0_4 = arith.constant 0 : index
    %3 = vector.load %arg3[%c0_3, %c0_4] : memref<1x50xf32, #tpu.memory_space<vmem>>, vector<1x50xf32>
    %4 = vector.broadcast %3 : vector<1x50xf32> to vector<8x50xf32>
    %5 = arith.addf %2, %4 : vector<8x50xf32>
    %cst_5 = arith.constant 0.000000e+00 : f32
    %6 = vector.broadcast %cst_5 : f32 to vector<8x50xf32>
    %7 = arith.maximumf %5, %6 : vector<8x50xf32>
    %c0_6 = arith.constant 0 : index
    %c0_7 = arith.constant 0 : index
    %8 = vector.load %arg4[%c0_6, %c0_7] : memref<50x30xf32, #tpu.memory_space<vmem>>, vector<50x30xf32>
    %cst_8 = arith.constant dense<0.000000e+00> : vector<8x30xf32>
    %9 = tpu.matmul %7, %8, %cst_8 {dimension_numbers = #tpu.dot_dimension_numbers<[1], [0], [0], [1], [0, 0, 1, 1], [], []>} : vector<8x50xf32>, vector<50x30xf32>, vector<8x30xf32> -> vector<8x30xf32>
    %c0_9 = arith.constant 0 : index
    %c0_10 = arith.constant 0 : index
    %10 = vector.load %arg5[%c0_9, %c0_10] : memref<1x30xf32, #tpu.memory_space<vmem>>, vector<1x30xf32>
    %11 = vector.broadcast %10 : vector<1x30xf32> to vector<8x30xf32>
    %12 = arith.addf %9, %11 : vector<8x30xf32>
    %c0_11 = arith.constant 0 : index
    %c0_12 = arith.constant 0 : index
    %13 = vector.load %arg6[%c0_11, %c0_12] : memref<8x30xf32, #tpu.memory_space<vmem>>, vector<8x30xf32>
    tpu.vector_store %arg6[%c0_11, %c0_12], %12 {strides = array<i32>} : memref<8x30xf32, #tpu.memory_space<vmem>>, vector<8x30xf32>,
    return
  }
  func.func @transform_0(%arg0: i32) -> (i32, i32) {
    %c0_i32 = arith.constant 0 : i32
    %c0_i32_0 = arith.constant 0 : i32
    return %arg0, %c0_i32 : i32, i32
  }
  func.func @transform_1(%arg0: i32) -> (i32, i32) {
    %c0_i32 = arith.constant 0 : i32
    %c0_i32_0 = arith.constant 0 : i32
    %c0_i32_1 = arith.constant 0 : i32
    return %c0_i32, %c0_i32_0 : i32, i32
  }
  func.func @transform_2(%arg0: i32) -> (i32, i32) {
    %c0_i32 = arith.constant 0 : i32
    %c0_i32_0 = arith.constant 0 : i32
    %c0_i32_1 = arith.constant 0 : i32
    return %c0_i32, %c0_i32_0 : i32, i32
  }
  func.func @transform_3(%arg0: i32) -> (i32, i32) {
    %c0_i32 = arith.constant 0 : i32
    %c0_i32_0 = arith.constant 0 : i32
    %c0_i32_1 = arith.constant 0 : i32
    return %c0_i32, %c0_i32_0 : i32, i32
  }
  func.func @transform_4(%arg0: i32) -> (i32, i32) {
    %c0_i32 = arith.constant 0 : i32
    %c0_i32_0 = arith.constant 0 : i32
    %c0_i32_1 = arith.constant 0 : i32
    return %c0_i32, %c0_i32_0 : i32, i32
  }
  func.func @transform_5(%arg0: i32) -> (i32, i32) {
    %c0_i32 = arith.constant 0 : i32
    %c0_i32_0 = arith.constant 0 : i32
    return %arg0, %c0_i32 : i32, i32
  }
}

</mosaic_0001>

<bundles_post_ra>
// kernel: convnet_forward.1
= control target key start
LH: loop header
LB: loop body
LE: loop exit
PB: predicated region body
PF: predicated region fallthrough
CT: control target
= control target key end

     0   :  { %vm34_vm0 = vcmask 1045504   ;;  %vm74_vm1 = vcmask 1041408   ;;  %s226_s0 = inlined_call_operand.vmem [shape: f32[8,30], index: 0, kind: input, shape index: {}]   ;;  %s227_s1 = inlined_call_operand.vmem [shape: f32[30,50], index: 1, kind: input, shape index: {}]   ;;  %s228_s2 = inlined_call_operand.vmem [shape: f32[1,50], index: 2, kind: input, shape index: {}]   ;;  %s229_s3 = inlined_call_operand.vmem [shape: f32[50,30], index: 3, kind: input, shape index: {}]   ;;  %s230_s4 = inlined_call_operand.vmem [shape: f32[1,30], index: 4, kind: input, shape index: {}]   ;;  %s231_s5 = inlined_call_operand.hbm [shape: f32[8,30], index: 5, kind: output, shape index: {}]  }
   0x1   :  { %v25_v0 = vld [vmem:[%s227_s1 + $0x18] sm:$0x3f]  ;;  %v24_v1 = vld [vmem:[%s227_s1 + $0x10] sm:$0xff]  ;;  %v23_v3 = vld [vmem:[%s227_s1 + $0x8] sm:$0xff] }
   0x2   :  { %115 = vmatpush.msk.msra.mxu0 %vm34_vm0, %v25_v0  ;;  %v65_v2 = vld [vmem:[%s229_s3 + $0x30] sm:$0x3]  ;;  %v64_v4 = vld [vmem:[%s229_s3 + $0x28] sm:$0xff]  ;;  %v63_v5 = vld [vmem:[%s229_s3 + $0x20] sm:$0xff] }
   0x3   :  { %117 = vmatpush.msk.msra.mxu1 %vm74_vm1, %v65_v2  ;;  %v22_v6 = vld [vmem:[%s227_s1] sm:$0xff] }
   0x4   :  { %51 = vmatpush.msra.mxu0 %v24_v1 }
   0x5   :  { %88 = vmatpush.msra.mxu1 %v64_v4 }
   0x6   :  { %10 = vsyncpa [#allocation3], 0  ;;  %52 = vmatpush.msra.mxu0 %v23_v3  ;;  %v21_v7 = vld [vmem:[%s226_s0] sm:$0xff]  ;;  %vm30_vm2 = vcmask 244736   ;;  %v62_v8 = vld [vmem:[%s229_s3 + $0x18] sm:$0xff]  ;;  %vm70_vm3 = vcmask 408576  }
   0x7   :  { %89 = vmatpush.msra.mxu1 %v63_v5  ;;  %v61_v9 = vld [vmem:[%s229_s3 + $0x10] sm:$0xff]  ;;  %v60_v10 = vld [vmem:[%s229_s3 + $0x8] sm:$0xff]  ;;  %v59_v11 = vld [vmem:[%s229_s3] sm:$0xff]  ;;  %s148_s19 = smov [#allocation2]   ;;  %s106_s3 = sshll.u32 %s231_s5, 4  ;;  %s107_s3 = int_to_ptr.hbm [resolvable:$true] %s106_s3 }
   0x8   :  { %53 = vmatpush.msra.mxu0 %v22_v6  ;;  %v120_v12 = vld [vmem:[%s228_s2] ss:$0 sm:$0xff]  ;;  %s104_s20 = sshll.u32 %s148_s19, 4  ;;  %s105_s20 = int_to_ptr.vmem [resolvable:$true] %s104_s20 }
   0x9   :  { %116 = vmatmul.msk.f32.vlgmr.msra.gmra.mxu0 %vm30_vm2, %v21_v7  ;;  %90 = vmatpush.msra.mxu1 %v62_v8  ;;  %v121_v16 = vld [vmem:[%s230_s4] ss:$0 sm:$0xff] }
   0xb   :  { %91 = vmatpush.msra.mxu1 %v61_v9 }
   0xd   :  { %92 = vmatpush.msra.mxu1 %v60_v10 }
   0xf   :  { %93 = vmatpush.msra.mxu1 %v59_v11 }
  0x86   :  { %v55_v13 = vpop.f32.mrf.mxu0 }
  0x87   :  { %v56_v14 = vadd.f32 %v120_v12, %v55_v13 }
  0x89   :  { %v58_v15 = vmax.f32 %v56_v14, 0.0 }
  0x8b   :  { %118 = vmatmul.msk.f32.vlgmr.msra.gmra.mxu1 %vm70_vm3, %v58_v15 }
 0x108   :  { %v95_v17 = vpop.f32.mrf.mxu1 }
 0x109   :  { %v96_v18 = vadd.f32 %v121_v16, %v95_v17 }
 0x10b   :  { %98 = vst.msk [vmem:[#allocation2] sm:$0xff] %vm30_vm2, %v96_v18 }
 0x10c   :  { %109 = dma.vmem_to_hbm [thread:$0]  %s105_s20, 128, %s107_s3, [#allocation3]  }
 0x10d   :  { %146 = dma.done.wait [#allocation3], 128  }
 0x10e   :  { %147 = vsyncadd [#allocation3], 4294967168 }
 0x10f   :  { %114 = vsyncpa [#allocation3], 1 }

</bundles_post_ra>
